<compile_context>
chip_gen: v6e
topology: v6e:2x2x1
jax: 0.10.0
libtpu: 0.0.40
codegen_flags: <defaults>
</compile_context>

<pallas_src>
import jax
import jax.numpy as jnp
from jax import lax
from jax.experimental import pallas as pl
from jax.experimental.pallas import tpu as pltpu


def _round_up(x, n):
    return ((x + n - 1) // n) * n


def _residual_kernel(x_ref, y_ref, w_ref, b_ref, o_ref, acc_ref):
    """o = x + y @ W^T + b, accumulated over the K grid axis in f32."""
    k = pl.program_id(1)

    @pl.when(k == 0)
    def _():
        acc_ref[...] = jnp.zeros_like(acc_ref)

    # Contract y's last dim against the weight's last (input) dim: y @ W^T
    # without materializing weight.T in the wrapper. MXU accumulates in f32.
    acc_ref[...] += lax.dot_general(
        y_ref[...], w_ref[...],
        dimension_numbers=(((1,), (1,)), ((), ())),
        preferred_element_type=jnp.float32,
    )

    @pl.when(k == pl.num_programs(1) - 1)
    def _():
        o_ref[...] = (
            x_ref[...].astype(jnp.float32)
            + acc_ref[...]
            + b_ref[...].astype(jnp.float32)
        ).astype(o_ref.dtype)


def residual_connection(x, y, weight, bias, *, tile_rows=512, tile_k=None,
                        matmul_dtype=None):
    """x, y: (..., d); weight: (d, d) in PyTorch (out, in) layout; bias: (d,).

    tile_rows:    row-tile size (clipped / padded to the data; keep it a
                  multiple of 128/256 for real workloads).
    tile_k:       optional contraction-tile size (rounded up to 128); None
                  keeps the whole weight resident in VMEM.
    matmul_dtype: optional dtype (e.g. jnp.bfloat16) for the y / weight
                  streams; accumulation stays in f32.
    """
    assert x.shape == y.shape
    d = x.shape[-1]
    assert weight.shape == (d, d) and bias.shape == (d,)

    lead = x.shape[:-1]
    m = 1
    for s in lead:
        m *= s

    x2 = x.reshape(m, d)
    y2 = y.reshape(m, d)
    b2 = bias.reshape(1, d)

    # Row tiling: big tiles, pad the tail instead of asserting divisibility.
    tr = min(tile_rows, _round_up(m, 8))
    m_pad = _round_up(m, tr)
    if m_pad != m:
        x2 = jnp.pad(x2, ((0, m_pad - m), (0, 0)))
        y2 = jnp.pad(y2, ((0, m_pad - m), (0, 0)))

    # K (contraction) tiling bounds the resident weight tile to d*tile_k.
    if tile_k is None or tile_k >= d:
        tk = d
        k_pad = d
    else:
        tk = _round_up(tile_k, 128)          # lane-aligned K blocks
        k_pad = _round_up(d, tk)
    w2 = weight
    if k_pad != d:
        y2 = jnp.pad(y2, ((0, 0), (0, k_pad - d)))
        w2 = jnp.pad(w2, ((0, 0), (0, k_pad - d)))

    # Optional reduced-precision operands for the HBM-bound matmul streams.
    if matmul_dtype is not None:
        y2 = y2.astype(matmul_dtype)
        w2 = w2.astype(matmul_dtype)

    grid = (m_pad // tr, k_pad // tk)

    # Scoped-VMEM sizing: double-buffered tiles + f32 accumulator + headroom.
    est = (2 * tr * d * x2.dtype.itemsize          # x tiles
           + 2 * tr * tk * y2.dtype.itemsize       # y tiles
           + 2 * d * tk * w2.dtype.itemsize        # weight tiles
           + 2 * d * b2.dtype.itemsize             # bias
           + 2 * tr * d * x.dtype.itemsize         # output tiles
           + tr * d * 4)                           # f32 accumulator scratch
    vmem_limit = int(min(max(est + (8 << 20), 32 << 20), 64 << 20))

    # TODO(synk): for production, keep d a multiple of 128 (pad the feature
    # dim) so output stores are lane-dense (unmasked vst) instead of masked.
    out = pl.pallas_call(
        _residual_kernel,
        out_shape=jax.ShapeDtypeStruct((m_pad, d), x.dtype),
        grid_spec=pltpu.PrefetchScalarGridSpec(
            num_scalar_prefetch=0,
            grid=grid,
            in_specs=[
                pl.BlockSpec((tr, d), lambda i, k: (i, 0)),    # x rows (reused over k)
                pl.BlockSpec((tr, tk), lambda i, k: (i, k)),   # y rows, K-tiled
                pl.BlockSpec((d, tk), lambda i, k: (0, k)),    # weight (out, in), K-tiled
                pl.BlockSpec((1, d), lambda i, k: (0, 0)),     # bias (resident)
            ],
            out_specs=pl.BlockSpec((tr, d), lambda i, k: (i, 0)),
            scratch_shapes=[pltpu.VMEM((tr, d), jnp.float32)],
        ),
        compiler_params=pltpu.CompilerParams(
            dimension_semantics=("parallel", "arbitrary"),
            vmem_limit_bytes=vmem_limit,
        ),
    )(x2, y2, w2, b2)

    if m_pad != m:
        out = out[:m]
    return out.reshape(*lead, d)


if __name__ == "__main__":
    # --- Case 1: small shapes matching the module, f32 end to end. ---
    B, N, D = 2, 8, 32
    key = jax.random.PRNGKey(0)
    kx, ky, kw, kb = jax.random.split(key, 4)

    x = jax.random.normal(kx, (B, N, D), dtype=jnp.float32)
    y = jax.random.normal(ky, (B, N, D), dtype=jnp.float32)
    bound = 1.0 / (D ** 0.5)
    weight = jax.random.uniform(kw, (D, D), jnp.float32, -bound, bound)  # (out, in)
    bias = jax.random.uniform(kb, (D,), jnp.float32, -bound, bound)

    out = jax.block_until_ready(residual_connection(x, y, weight, bias))
    ref = x + (jnp.einsum("bnd,od->bno", y, weight) + bias)
    assert jnp.allclose(out, ref, atol=1e-5, rtol=1e-5), "f32 path mismatch"

    # --- Case 2: exercise row-tail padding, K tiling and bf16 matmul operands. ---
    B2, N2, D2 = 2, 7, 256
    kx2, ky2, kw2, kb2 = jax.random.split(jax.random.PRNGKey(1), 4)
    x_b = jax.random.normal(kx2, (B2, N2, D2), dtype=jnp.float32)
    y_b = jax.random.normal(ky2, (B2, N2, D2), dtype=jnp.float32)
    bound2 = 1.0 / (D2 ** 0.5)
    w_b = jax.random.uniform(kw2, (D2, D2), jnp.float32, -bound2, bound2)
    b_b = jax.random.uniform(kb2, (D2,), jnp.float32, -bound2, bound2)

    out_b = jax.block_until_ready(
        residual_connection(x_b, y_b, w_b, b_b, tile_rows=128, tile_k=128,
                            matmul_dtype=jnp.bfloat16))
    ref_b = x_b + (jnp.einsum("bnd,od->bno", y_b, w_b) + b_b)
    assert jnp.allclose(out_b, ref_b, atol=5e-2, rtol=5e-2), "bf16/K-tiled path mismatch"

    print("KERNEL_OK")
</pallas_src>

<mosaic_0001>
module attributes {stable_mosaic.version = 11 : i64} {
  func.func @_residual_kernel(%arg0: i32, %arg1: i32, %arg2: memref<16x32xf32, #tpu.memory_space<vmem>>, %arg3: memref<16x32xf32, #tpu.memory_space<vmem>>, %arg4: memref<32x32xf32, #tpu.memory_space<vmem>>, %arg5: memref<1x32xf32, #tpu.memory_space<vmem>>, %arg6: memref<16x32xf32, #tpu.memory_space<vmem>>, %arg7: memref<16x32xf32, #tpu.memory_space<vmem>>) attributes {dimension_semantics = [#tpu.dimension_semantics<parallel>, #tpu.dimension_semantics<arbitrary>], iteration_bounds = array<i64: 1, 1>, scalar_prefetch = 0 : i64, scratch_operands = 1 : i64, tpu.core_type = #tpu.core_type<tc>, window_params = [{transform_indices = @transform_0, window_bounds = array<i64: 16, 32>}, {transform_indices = @transform_1, window_bounds = array<i64: 16, 32>}, {transform_indices = @transform_2, window_bounds = array<i64: 32, 32>}, {pipeline_mode = #tpu.pipeline_mode<synchronous>, transform_indices = @transform_3, window_bounds = array<i64: 1, 32>}, {transform_indices = @transform_4, window_bounds = array<i64: 16, 32>}]} {
    %c0_i32 = arith.constant 0 : i32
    %0 = arith.cmpi eq, %arg1, %c0_i32 : i32
    %1 = arith.extui %0 : i1 to i32
    %c0_i32_0 = arith.constant 0 : i32
    %2 = arith.cmpi ne, %1, %c0_i32_0 : i32
    scf.if %2 {
      %cst_10 = arith.constant 0.000000e+00 : f32
      %12 = vector.broadcast %cst_10 : f32 to vector<16x32xf32>
      %c0_11 = arith.constant 0 : index
      %c0_12 = arith.constant 0 : index
      %13 = vector.load %arg7[%c0_11, %c0_12] : memref<16x32xf32, #tpu.memory_space<vmem>>, vector<16x32xf32>
      tpu.vector_store %arg7[%c0_11, %c0_12], %12 {strides = array<i32>} : memref<16x32xf32, #tpu.memory_space<vmem>>, vector<16x32xf32>,
    } else {
    }
    %c0 = arith.constant 0 : index
    %c0_1 = arith.constant 0 : index
    %3 = vector.load %arg7[%c0, %c0_1] : memref<16x32xf32, #tpu.memory_space<vmem>>, vector<16x32xf32>
    %c0_2 = arith.constant 0 : index
    %c0_3 = arith.constant 0 : index
    %4 = vector.load %arg3[%c0_2, %c0_3] : memref<16x32xf32, #tpu.memory_space<vmem>>, vector<16x32xf32>
    %c0_4 = arith.constant 0 : index
    %c0_5 = arith.constant 0 : index
    %5 = vector.load %arg4[%c0_4, %c0_5] : memref<32x32xf32, #tpu.memory_space<vmem>>, vector<32x32xf32>
    %cst = arith.constant dense<0.000000e+00> : vector<16x32xf32>
    %6 = tpu.matmul %4, %5, %cst {dimension_numbers = #tpu.dot_dimension_numbers<[1], [1], [0], [0], [0, 0, 1, 0], [], []>} : vector<16x32xf32>, vector<32x32xf32>, vector<16x32xf32> -> vector<16x32xf32>
    %7 = arith.addf %3, %6 : vector<16x32xf32>
    %c0_6 = arith.constant 0 : index
    %c0_7 = arith.constant 0 : index
    %8 = vector.load %arg7[%c0_6, %c0_7] : memref<16x32xf32, #tpu.memory_space<vmem>>, vector<16x32xf32>
    tpu.vector_store %arg7[%c0_6, %c0_7], %7 {strides = array<i32>} : memref<16x32xf32, #tpu.memory_space<vmem>>, vector<16x32xf32>,
    %c0_i32_8 = arith.constant 0 : i32
    %9 = arith.cmpi eq, %arg1, %c0_i32_8 : i32
    %10 = arith.extui %9 : i1 to i32
    %c0_i32_9 = arith.constant 0 : i32
    %11 = arith.cmpi ne, %10, %c0_i32_9 : i32
    scf.if %11 {
      %c0_10 = arith.constant 0 : index
      %c0_11 = arith.constant 0 : index
      %12 = vector.load %arg2[%c0_10, %c0_11] : memref<16x32xf32, #tpu.memory_space<vmem>>, vector<16x32xf32>
      %c0_12 = arith.constant 0 : index
      %c0_13 = arith.constant 0 : index
      %13 = vector.load %arg7[%c0_12, %c0_13] : memref<16x32xf32, #tpu.memory_space<vmem>>, vector<16x32xf32>
      %14 = arith.addf %12, %13 : vector<16x32xf32>
      %c0_14 = arith.constant 0 : index
      %c0_15 = arith.constant 0 : index
      %15 = vector.load %arg5[%c0_14, %c0_15] : memref<1x32xf32, #tpu.memory_space<vmem>>, vector<1x32xf32>
      %16 = vector.broadcast %15 : vector<1x32xf32> to vector<16x32xf32>
      %17 = arith.addf %14, %16 : vector<16x32xf32>
      %c0_16 = arith.constant 0 : index
      %c0_17 = arith.constant 0 : index
      %18 = vector.load %arg6[%c0_16, %c0_17] : memref<16x32xf32, #tpu.memory_space<vmem>>, vector<16x32xf32>
      tpu.vector_store %arg6[%c0_16, %c0_17], %17 {strides = array<i32>} : memref<16x32xf32, #tpu.memory_space<vmem>>, vector<16x32xf32>,
    } else {
    }
    return
  }
  func.func @transform_0(%arg0: i32, %arg1: i32) -> (i32, i32) {
    %c0_i32 = arith.constant 0 : i32
    %c0_i32_0 = arith.constant 0 : i32
    return %arg0, %c0_i32 : i32, i32
  }
  func.func @transform_1(%arg0: i32, %arg1: i32) -> (i32, i32) {
    %c0_i32 = arith.constant 0 : i32
    return %arg0, %arg1 : i32, i32
  }
  func.func @transform_2(%arg0: i32, %arg1: i32) -> (i32, i32) {
    %c0_i32 = arith.constant 0 : i32
    %c0_i32_0 = arith.constant 0 : i32
    return %c0_i32, %arg1 : i32, i32
  }
  func.func @transform_3(%arg0: i32, %arg1: i32) -> (i32, i32) {
    %c0_i32 = arith.constant 0 : i32
    %c0_i32_0 = arith.constant 0 : i32
    %c0_i32_1 = arith.constant 0 : i32
    return %c0_i32, %c0_i32_0 : i32, i32
  }
  func.func @transform_4(%arg0: i32, %arg1: i32) -> (i32, i32) {
    %c0_i32 = arith.constant 0 : i32
    %c0_i32_0 = arith.constant 0 : i32
    return %arg0, %c0_i32 : i32, i32
  }
}

</mosaic_0001>

<bundles_post_ra>
// kernel: tpu_custom_call.1
= control target key start
LH: loop header
LB: loop body
LE: loop exit
PB: predicated region body
PF: predicated region fallthrough
CT: control target
= control target key end

     0   :  { %9 = vsyncpa [#allocation4], 0  ;;  %s402_s0 = inlined_call_operand.hbm [shape: f32[16,32], index: 0, kind: input, shape index: {}]   ;;  %s403_s1 = inlined_call_operand.hbm [shape: f32[16,32], index: 1, kind: input, shape index: {}]   ;;  %s404_s2 = inlined_call_operand.hbm [shape: f32[32,32], index: 2, kind: input, shape index: {}]   ;;  %s405_s3 = inlined_call_operand.vmem [shape: f32[1,32], index: 3, kind: input, shape index: {}]   ;;  %s406_s4 = inlined_call_operand.hbm [shape: f32[16,32], index: 4, kind: output, shape index: {}]  }
   0x1   :  { %10 = vsyncpa [#allocation7], 0 }
   0x2   :  { %11 = vsyncpa [#allocation5], 0  ;;  %s327_s15 = smov [#allocation6]   ;;  %s328_s17 = smov [#allocation3]  }
   0x3   :  { %s29_s16 = sshll.u32 %s327_s15, 4  ;;  %s17_s18 = sshll.u32 %s328_s17, 4  ;;  %s30_s16 = int_to_ptr.vmem [resolvable:$true] %s29_s16  ;;  %s18_s18 = int_to_ptr.vmem [resolvable:$true] %s17_s18 }
   0x4   :  { %s249_s19 = scalar_lea.vmem %s30_s16, 256  ;;  %p254_p1 = scmp.lt.s32.totalorder %s30_s16, %s30_s16 }
   0x5   :  { %p250_p0 = scmp.ne.s32.totalorder %s30_s16, %s249_s19  ;;  %p255_p2 = scmp.lt.s32.totalorder %s249_s19, %s249_s19 }
   0x7   :  { %p256_p3 = por %p255_p2, %p254_p1 }
   0x9   :  { %p257_p4 = pnand %p256_p3, %p250_p0 }
   0xb   :  { %260 = shalt.err (!%p257_p4)
}
   0xc   :  { %s329_s20 = smov 128   ;;  %s330_s21 = smov 8  }
   0xd   :  { %35 = dma.hbm_to_vmem [thread:$0]  %s403_s1, 256, %s30_s16, [#allocation7], %s329_s20, %s329_s20, %s330_s21  }
   0xe   :  { %s269_s24 = scalar_lea.vmem %s18_s18, 256  ;;  %p274_p6 = scmp.lt.s32.totalorder %s18_s18, %s18_s18 }
   0xf   :  { %p270_p5 = scmp.ne.s32.totalorder %s18_s18, %s269_s24  ;;  %p275_p7 = scmp.lt.s32.totalorder %s269_s24, %s269_s24 }
  0x11   :  { %p276_p8 = por %p275_p7, %p274_p6 }
  0x13   :  { %p277_p9 = pnand %p276_p8, %p270_p5 }
  0x15   :  { %280 = shalt.err (!%p277_p9)
}
  0x16   :  { %23 = dma.hbm_to_vmem [thread:$0]  %s402_s0, 256, %s18_s18, [#allocation4], %s329_s20, %s329_s20, %s330_s21  }
  0x17   :  { %s331_s27 = smov [#allocation8]  }
  0x18   :  { %s41_s28 = sshll.u32 %s331_s27, 4  ;;  %s42_s28 = int_to_ptr.vmem [resolvable:$true] %s41_s28 }
  0x19   :  { %s289_s29 = scalar_lea.vmem %s42_s28, 512  ;;  %p294_p11 = scmp.lt.s32.totalorder %s42_s28, %s42_s28 }
  0x1a   :  { %p290_p10 = scmp.ne.s32.totalorder %s42_s28, %s289_s29  ;;  %p295_p12 = scmp.lt.s32.totalorder %s289_s29, %s289_s29 }
  0x1c   :  { %p296_p13 = por %p295_p12, %p294_p11 }
  0x1e   :  { %p297_p0 = pnand %p296_p13, %p290_p10 }
  0x20   :  { %300 = shalt.err (!%p297_p0)
}
  0x21   :  { %47 = dma.hbm_to_vmem [thread:$0]  %s404_s2, 512, %s42_s28, [#allocation7], %s329_s20, %s329_s20, %s330_s21  }
  0x22   :  { %321 = dma.done.wait [#allocation4], 256  }
  0x23   :  { %322 = vsyncadd [#allocation4], 4294967040 }
  0x24   :  { %323 = dma.done.wait [#allocation7], 768  }
  0x25   :  { %324 = vsyncadd [#allocation7], 4294966528  ;;  %vm63_vm0 = vcmask 261120   ;;  %v332_v0 = vmov 0.0   ;;  %v73_v1 = vld [vmem:[#allocation8 + $0x18] sm:$0xff]  ;;  %v72_v2 = vld [vmem:[#allocation8 + $0x10] sm:$0xff] }
  0x26   :  { %65 = vst.msk [vmem:[#allocation2 + $0x8] sm:$0xff] %vm63_vm0, %v332_v0  ;;  %64 = vst.msk [vmem:[#allocation2] sm:$0xff] %vm63_vm0, %v332_v0  ;;  %223 = vmatprep.subr.msk.mxu0 %vm63_vm0, %v73_v1  ;;  %v68_v3 = vld [vmem:[#allocation6] sm:$0xff]  ;;  %v71_v4 = vld [vmem:[#allocation8 + $0x8] sm:$0xff]  ;;  %s333_s5 = smov [#allocation9]  }
  0x27   :  { %224 = vmatpush3.xpose.msk.msra.mxu0 %vm63_vm0, %v73_v1  ;;  %231 = vmatprep.mubr.msk.f32.mxu0 %vm63_vm0, %v68_v3  ;;  %v70_v5 = vld [vmem:[#allocation8] sm:$0xff]  ;;  %v69_v6 = vld [vmem:[#allocation6 + $0x8] sm:$0xff]  ;;  %v176_v13 = vld [vmem:[#allocation3 + $0x8] sm:$0xff]  ;;  %s197_s6 = sshll.u32 %s333_s5, 4  ;;  %s198_s6 = int_to_ptr.vmem [resolvable:$true] %s197_s6 }
  0x28   :  { %225 = vmatprep.subr.msk.mxu0 %vm63_vm0, %v72_v2  ;;  %v175_v14 = vld [vmem:[#allocation3] sm:$0xff]  ;;  %v216_v16 = vld [vmem:[%s405_s3] ss:$0 sm:$0xff]  ;;  %s301_s7 = scalar_lea.vmem %s198_s6, 256  ;;  %p306_p2 = scmp.lt.s32.totalorder %s198_s6, %s198_s6 }
  0x29   :  { %p302_p1 = scmp.ne.s32.totalorder %s198_s6, %s301_s7  ;;  %p307_p3 = scmp.lt.s32.totalorder %s301_s7, %s301_s7 }
  0x2b   :  { %226 = vmatpush3.xpose.msk.msra.mxu0 %vm63_vm0, %v72_v2  ;;  %p308_p4 = por %p307_p3, %p306_p2 }
  0x2c   :  { %227 = vmatprep.subr.msk.mxu0 %vm63_vm0, %v71_v4 }
  0x2d   :  { %v67_v7 = vld [vmem:[#allocation2 + $0x8] sm:$0xff]  ;;  %v66_v9 = vld [vmem:[#allocation2] sm:$0xff]  ;;  %p309_p5 = pnand %p308_p4, %p302_p1 }
  0x2f   :  { %228 = vmatpush3.xpose.msk.msra.mxu0 %vm63_vm0, %v71_v4 }
  0x30   :  { %229 = vmatprep.subr.msk.mxu0 %vm63_vm0, %v70_v5 }
  0x33   :  { %230 = vmatpush3.xpose.msk.msra.mxu0 %vm63_vm0, %v70_v5 }
  0x36   :  { %232 = vmatmul.mubr.msk.f32.vlgmr.msra.gmra.mxu0 %vm63_vm0, %v69_v6 }
  0xf6   :  { %v233_v8 = vpop.f32.mrf.mxu0 }
  0xf7   :  { %v169_v10 = vadd.f32 %v233_v8, %v67_v7 }
  0xf8   :  { %v159_v11 = vpop.f32.mrf.mxu0 }
  0xf9   :  { %171 = vst.msk [vmem:[#allocation2 + $0x8] sm:$0xff] %vm63_vm0, %v169_v10  ;;  %v168_v12 = vadd.f32 %v159_v11, %v66_v9 }
  0xfb   :  { %170 = vst.msk [vmem:[#allocation2] sm:$0xff] %vm63_vm0, %v168_v12 }
 0x100   :  { %v178_v15 = vld [vmem:[#allocation2 + $0x8] sm:$0xff] }
 0x101   :  { %v180_v17 = vadd.f32 %v178_v15, %v176_v13 }
 0x102   :  { %v177_v18 = vld [vmem:[#allocation2] sm:$0xff] }
 0x103   :  { %v179_v19 = vadd.f32 %v177_v18, %v175_v14  ;;  %v189_v20 = vadd.f32 %v216_v16, %v180_v17 }
 0x105   :  { %v188_v21 = vadd.f32 %v216_v16, %v179_v19  ;;  %191 = vst.msk [vmem:[#allocation9 + $0x8] sm:$0xff] %vm63_vm0, %v189_v20 }
 0x107   :  { %190 = vst.msk [vmem:[#allocation9] sm:$0xff] %vm63_vm0, %v188_v21 }
 0x108   :  { %312 = shalt.err (!%p309_p5)
}
 0x109   :  { %203 = dma.vmem_to_hbm [thread:$0]  %s198_s6, 256, %s406_s4, [#allocation5], %s329_s20, %s329_s20, %s330_s21  }
 0x10a   :  { %325 = dma.done.wait [#allocation5], 256  }
 0x10b   :  { %326 = vsyncadd [#allocation5], 4294967040 }
 0x10c   :  { %207 = vsyncpa [#allocation4], 1 }
 0x10d   :  { %208 = vsyncpa [#allocation7], 1 }
 0x10e   :  { %209 = vsyncpa [#allocation5], 1 }

</bundles_post_ra>
